<compile_context>
chip_gen: v6e
topology: v6e:2x2x1
jax: 0.10.0
libtpu: 0.0.40
codegen_flags: <defaults>
</compile_context>

<pallas_src>
import functools

import jax
import jax.numpy as jnp
from jax.experimental import pallas as pl
from jax.experimental.pallas import tpu as pltpu


def _round_up(v, m):
    return -(-v // m) * m


def _pad2(a, rows, cols):
    return jnp.pad(a, ((0, rows - a.shape[0]), (0, cols - a.shape[1])))


def _hash32(x):
    # "lowbias32" integer avalanche mix -- cheap VPU int ops only.
    x = x ^ (x >> 16)
    x = x * jnp.uint32(0x7FEB352D)
    x = x ^ (x >> 15)
    x = x * jnp.uint32(0x846CA68B)
    x = x ^ (x >> 16)
    return x


def _keep_mask(shape, seed_i32, salt, row0_i32, thresh_u32):
    """Stateless Bernoulli(keep = 1-p) mask: hash(global_row, col, seed, salt)."""
    rows = (jax.lax.broadcasted_iota(jnp.int32, shape, 0) + row0_i32).astype(jnp.uint32)
    cols = jax.lax.broadcasted_iota(jnp.int32, shape, 1).astype(jnp.uint32)
    x = (rows * jnp.uint32(0x9E3779B1)) ^ (cols * jnp.uint32(0x85EBCA77))
    x = x ^ seed_i32.astype(jnp.uint32)
    x = x + jnp.uint32((salt * 0x68E31DA4) & 0xFFFFFFFF)
    x = _hash32(_hash32(x))
    return (x >> 8) >= thresh_u32  # top 24 bits vs. int(p * 2^24)


def prenet_kernel(seed_ref, x_ref, w1_ref, b1_ref, w2_ref, b2_ref, o_ref, *, p):
    apply_dropout = p > 0.0
    if apply_dropout:
        seed32 = seed_ref[0]
        row0 = pl.program_id(0) * x_ref.shape[0]          # global row offset of this tile
        thresh = jnp.uint32(int(round(p * (1 << 24))))
        scale = jnp.float32(1.0 / (1.0 - p))

    # fc1 + ReLU  (bf16 MXU operands, f32 accumulate / elementwise)
    h = jnp.dot(x_ref[...].astype(jnp.bfloat16), w1_ref[...],
                preferred_element_type=jnp.float32)
    h = jnp.maximum(h + b1_ref[...], 0.0)

    # dropout 1 (training=True). Scale 1/(1-p) is folded into W2 -> plain select.
    if apply_dropout:
        keep1 = _keep_mask(h.shape, seed32, 1, row0, thresh)
        h = jnp.where(keep1, h, 0.0)

    # fc2 + ReLU
    h2 = jnp.dot(h.astype(jnp.bfloat16), w2_ref[...],
                 preferred_element_type=jnp.float32)
    h2 = jnp.maximum(h2 + b2_ref[...], 0.0)

    # dropout 2 (training=True): fused select + single scale multiply.
    if apply_dropout:
        keep2 = _keep_mask(h2.shape, seed32, 2, row0, thresh)
        h2 = jnp.where(keep2, h2 * scale, 0.0)

    o_ref[...] = h2.astype(o_ref.dtype)


def decoder_prenet(x, w1, b1, w2, b2, *, seed, p=0.5, tm=512):
    """DecoderPreNet forward (dropout always active, as in the module).

    x : (..., input_dim) f32
    w1: (input_dim, hidden)  -- pre-transposed vs torch's (out, in)
    b1: (hidden,)            w2: (hidden, hidden)           b2: (hidden,)
    Returns (..., hidden) f32.
    """
    assert 0.0 <= p < 1.0
    D = x.shape[-1]
    H = w1.shape[1]
    x2d = x.reshape(-1, D).astype(jnp.float32)
    N = x2d.shape[0]

    # Lane-dense feature padding (multiples of 128).
    Dp = _round_up(D, 128)
    Hp = _round_up(H, 128)

    # Row tile: as large as comfortably fits VMEM (amortizes ~0.35 us per grid step).
    tm = min(tm, _round_up(N, 8))
    weight_vmem = 2 * ((Dp * Hp + Hp * Hp) * 2 + 2 * Hp * 4)   # double-buffered bf16 W + f32 b

    def _tile_vmem(t):  # double-buffered f32 x/out blocks + f32 intermediates/masks
        return 2 * (t * Dp * 4 + t * Hp * 4) + 6 * t * Hp * 4

    while tm > 8 and weight_vmem + _tile_vmem(tm) > 24 * 1024 * 1024:
        tm = max(8, ((tm // 2) // 8) * 8)
    Np = _round_up(N, tm)

    scale = 1.0 / (1.0 - p) if p > 0.0 else 1.0
    xp = _pad2(x2d, Np, Dp)
    w1p = _pad2(w1.astype(jnp.float32), Dp, Hp).astype(jnp.bfloat16)
    b1p = _pad2(b1.reshape(1, -1).astype(jnp.float32), 1, Hp)
    # Fold dropout-1 scale into W2:  (h*keep*scale) @ W2 == (h*keep) @ (scale*W2).
    w2p = _pad2((w2 * scale).astype(jnp.float32), Hp, Hp).astype(jnp.bfloat16)
    b2p = _pad2(b2.reshape(1, -1).astype(jnp.float32), 1, Hp)

    seed_arr = jnp.array([seed], dtype=jnp.int32)
    kernel = functools.partial(prenet_kernel, p=float(p))

    flops = 2 * Np * Hp * (Dp + Hp)
    bytes_accessed = (Np * Dp + Np * Hp) * 4 + (Dp * Hp + Hp * Hp) * 2 + 2 * Hp * 4

    out_p = pl.pallas_call(
        kernel,
        out_shape=jax.ShapeDtypeStruct((Np, Hp), jnp.float32),
        grid_spec=pltpu.PrefetchScalarGridSpec(
            num_scalar_prefetch=1,
            grid=(Np // tm,),
            in_specs=[
                pl.BlockSpec((tm, Dp), lambda i, s: (i, 0)),   # x row tile
                pl.BlockSpec((Dp, Hp), lambda i, s: (0, 0)),   # W1 (resident, bf16)
                pl.BlockSpec((1, Hp), lambda i, s: (0, 0)),    # b1
                pl.BlockSpec((Hp, Hp), lambda i, s: (0, 0)),   # scale*W2 (resident, bf16)
                pl.BlockSpec((1, Hp), lambda i, s: (0, 0)),    # b2
            ],
            out_specs=pl.BlockSpec((tm, Hp), lambda i, s: (i, 0)),
        ),
        compiler_params=pltpu.CompilerParams(
            # Grid steps are fully independent (stateless hash dropout) -> megacore OK.
            dimension_semantics=("parallel",),
            vmem_limit_bytes=32 * 1024 * 1024,
        ),
        cost_estimate=pl.CostEstimate(
            flops=flops, transcendentals=0, bytes_accessed=bytes_accessed),
    )(seed_arr, xp, w1p, b1p, w2p, b2p)

    return out_p[:N, :H].reshape(x.shape[:-1] + (H,))


def decoder_prenet_reference(x, w1, b1, w2, b2, *, seed, p=0.5):
    """Pure-jnp mirror of the kernel math (same padding, bf16 casts, hash mask)."""
    D = x.shape[-1]
    H = w1.shape[1]
    x2d = x.reshape(-1, D).astype(jnp.float32)
    N = x2d.shape[0]
    Dp = _round_up(D, 128)
    Hp = _round_up(H, 128)
    scale = 1.0 / (1.0 - p) if p > 0.0 else 1.0

    xp = _pad2(x2d, N, Dp)
    w1p = _pad2(w1.astype(jnp.float32), Dp, Hp).astype(jnp.bfloat16)
    b1p = _pad2(b1.reshape(1, -1).astype(jnp.float32), 1, Hp)
    w2p = _pad2((w2 * scale).astype(jnp.float32), Hp, Hp).astype(jnp.bfloat16)
    b2p = _pad2(b2.reshape(1, -1).astype(jnp.float32), 1, Hp)

    h = jnp.dot(xp.astype(jnp.bfloat16), w1p, preferred_element_type=jnp.float32)
    h = jnp.maximum(h + b1p, 0.0)
    if p > 0.0:
        thresh = jnp.uint32(int(round(p * (1 << 24))))
        s32 = jnp.int32(seed)
        h = jnp.where(_keep_mask(h.shape, s32, 1, 0, thresh), h, 0.0)
    h2 = jnp.dot(h.astype(jnp.bfloat16), w2p, preferred_element_type=jnp.float32)
    h2 = jnp.maximum(h2 + b2p, 0.0)
    if p > 0.0:
        h2 = jnp.where(_keep_mask(h2.shape, s32, 2, 0, thresh),
                       h2 * jnp.float32(scale), 0.0)
    return h2[:, :H].reshape(x.shape[:-1] + (H,))


if __name__ == "__main__":
    # Small shapes consistent with the module: batch=2, seq=8, input_dim=32, hidden=32.
    B, T, IN_DIM, HID = 2, 8, 32, 32
    DROPOUT_P = 0.5
    SEED = 1234

    key = jax.random.PRNGKey(0)
    kx, kw1, kb1, kw2, kb2 = jax.random.split(key, 5)

    x = jax.random.normal(kx, (B, T, IN_DIM), dtype=jnp.float32)
    # PyTorch Linear stores (out, in); we keep the transposed (in, out) layout so the
    # kernel hot path is a plain x @ W + b.
    w1 = jax.random.normal(kw1, (IN_DIM, HID), dtype=jnp.float32) * 0.1
    b1 = jax.random.normal(kb1, (HID,), dtype=jnp.float32) * 0.01
    w2 = jax.random.normal(kw2, (HID, HID), dtype=jnp.float32) * 0.1
    b2 = jax.random.normal(kb2, (HID,), dtype=jnp.float32) * 0.01

    out = decoder_prenet(x, w1, b1, w2, b2, seed=SEED, p=DROPOUT_P)
    jax.block_until_ready(out)

    assert out.shape == (B, T, HID)
    assert out.dtype == jnp.float32
    assert bool(jnp.all(out >= 0.0))  # ReLU + dropout output is non-negative

    # Cross-check against a pure-jnp mirror using the identical math / dropout mask.
    ref = decoder_prenet_reference(x, w1, b1, w2, b2, seed=SEED, p=DROPOUT_P)
    assert bool(jnp.allclose(out, ref, rtol=2e-2, atol=2e-2)), \
        float(jnp.max(jnp.abs(out - ref)))

    print("KERNEL_OK")
</pallas_src>

<mosaic_0001>
module attributes {stable_mosaic.version = 11 : i64} {
  func.func @prenet_kernel(%arg0: i32, %arg1: memref<1xi32, #tpu.memory_space<smem>>, %arg2: memref<16x128xf32, #tpu.memory_space<vmem>>, %arg3: memref<128x128xbf16, #tpu.memory_space<vmem>>, %arg4: memref<1x128xf32, #tpu.memory_space<vmem>>, %arg5: memref<128x128xbf16, #tpu.memory_space<vmem>>, %arg6: memref<1x128xf32, #tpu.memory_space<vmem>>, %arg7: memref<16x128xf32, #tpu.memory_space<vmem>>) attributes {dimension_semantics = [#tpu.dimension_semantics<parallel>], iteration_bounds = array<i64: 1>, scalar_prefetch = 1 : i64, scratch_operands = 0 : i64, tpu.core_type = #tpu.core_type<tc>, window_params = [{transform_indices = @transform_0, window_bounds = array<i64: 16, 128>}, {pipeline_mode = #tpu.pipeline_mode<synchronous>, transform_indices = @transform_1, window_bounds = array<i64: 128, 128>}, {pipeline_mode = #tpu.pipeline_mode<synchronous>, transform_indices = @transform_2, window_bounds = array<i64: 1, 128>}, {pipeline_mode = #tpu.pipeline_mode<synchronous>, transform_indices = @transform_3, window_bounds = array<i64: 128, 128>}, {pipeline_mode = #tpu.pipeline_mode<synchronous>, transform_indices = @transform_4, window_bounds = array<i64: 1, 128>}, {transform_indices = @transform_5, window_bounds = array<i64: 16, 128>}]} {
    %c0 = arith.constant 0 : index
    %0 = memref.load %arg1[%c0] : memref<1xi32, #tpu.memory_space<smem>>
    %c16_i32 = arith.constant 16 : i32
    %1 = arith.muli %arg0, %c16_i32 : i32
    %c0_0 = arith.constant 0 : index
    %c0_1 = arith.constant 0 : index
    %2 = vector.load %arg2[%c0_0, %c0_1] : memref<16x128xf32, #tpu.memory_space<vmem>>, vector<16x128xf32>
    %3 = arith.truncf %2 : vector<16x128xf32> to vector<16x128xbf16>
    %c0_2 = arith.constant 0 : index
    %c0_3 = arith.constant 0 : index
    %4 = vector.load %arg3[%c0_2, %c0_3] : memref<128x128xbf16, #tpu.memory_space<vmem>>, vector<128x128xbf16>
    %cst = arith.constant dense<0.000000e+00> : vector<16x128xf32>
    %5 = tpu.matmul %3, %4, %cst {dimension_numbers = #tpu.dot_dimension_numbers<[1], [0], [0], [1], [0, 0, 1, 1], [], []>} : vector<16x128xbf16>, vector<128x128xbf16>, vector<16x128xf32> -> vector<16x128xf32>
    %c0_4 = arith.constant 0 : index
    %c0_5 = arith.constant 0 : index
    %6 = vector.load %arg4[%c0_4, %c0_5] : memref<1x128xf32, #tpu.memory_space<vmem>>, vector<1x128xf32>
    %7 = vector.broadcast %6 : vector<1x128xf32> to vector<16x128xf32>
    %8 = arith.addf %5, %7 : vector<16x128xf32>
    %cst_6 = arith.constant 0.000000e+00 : f32
    %9 = vector.broadcast %cst_6 : f32 to vector<16x128xf32>
    %10 = arith.maximumf %8, %9 : vector<16x128xf32>
    %11 = tpu.iota {dimensions = array<i32: 0>} : vector<16x128xi32>
    %12 = vector.broadcast %1 : i32 to vector<16x128xi32>
    %13 = arith.addi %11, %12 : vector<16x128xi32>
    %14 = tpu.iota {dimensions = array<i32: 1>} : vector<16x128xi32>
    %c-1640531535_i32 = arith.constant -1640531535 : i32
    %15 = vector.broadcast %c-1640531535_i32 : i32 to vector<16x128xi32>
    %16 = arith.muli %13, %15 : vector<16x128xi32>
    %c-2048144777_i32 = arith.constant -2048144777 : i32
    %17 = vector.broadcast %c-2048144777_i32 : i32 to vector<16x128xi32>
    %18 = arith.muli %14, %17 : vector<16x128xi32>
    %19 = arith.xori %16, %18 : vector<16x128xi32>
    %20 = vector.broadcast %0 : i32 to vector<16x128xi32>
    %21 = arith.xori %19, %20 : vector<16x128xi32>
    %c1759714724_i32 = arith.constant 1759714724 : i32
    %22 = vector.broadcast %c1759714724_i32 : i32 to vector<16x128xi32>
    %23 = arith.addi %21, %22 : vector<16x128xi32>
    %c16_i32_7 = arith.constant 16 : i32
    %24 = vector.broadcast %c16_i32_7 : i32 to vector<16x128xi32>
    %25 = arith.shrui %23, %24 : vector<16x128xi32>
    %26 = arith.xori %23, %25 : vector<16x128xi32>
    %c2146121005_i32 = arith.constant 2146121005 : i32
    %27 = vector.broadcast %c2146121005_i32 : i32 to vector<16x128xi32>
    %28 = arith.muli %26, %27 : vector<16x128xi32>
    %c15_i32 = arith.constant 15 : i32
    %29 = vector.broadcast %c15_i32 : i32 to vector<16x128xi32>
    %30 = arith.shrui %28, %29 : vector<16x128xi32>
    %31 = arith.xori %28, %30 : vector<16x128xi32>
    %c-2073254261_i32 = arith.constant -2073254261 : i32
    %32 = vector.broadcast %c-2073254261_i32 : i32 to vector<16x128xi32>
    %33 = arith.muli %31, %32 : vector<16x128xi32>
    %c16_i32_8 = arith.constant 16 : i32
    %34 = vector.broadcast %c16_i32_8 : i32 to vector<16x128xi32>
    %35 = arith.shrui %33, %34 : vector<16x128xi32>
    %36 = arith.xori %33, %35 : vector<16x128xi32>
    %c16_i32_9 = arith.constant 16 : i32
    %37 = vector.broadcast %c16_i32_9 : i32 to vector<16x128xi32>
    %38 = arith.shrui %36, %37 : vector<16x128xi32>
    %39 = arith.xori %36, %38 : vector<16x128xi32>
    %c2146121005_i32_10 = arith.constant 2146121005 : i32
    %40 = vector.broadcast %c2146121005_i32_10 : i32 to vector<16x128xi32>
    %41 = arith.muli %39, %40 : vector<16x128xi32>
    %c15_i32_11 = arith.constant 15 : i32
    %42 = vector.broadcast %c15_i32_11 : i32 to vector<16x128xi32>
    %43 = arith.shrui %41, %42 : vector<16x128xi32>
    %44 = arith.xori %41, %43 : vector<16x128xi32>
    %c-2073254261_i32_12 = arith.constant -2073254261 : i32
    %45 = vector.broadcast %c-2073254261_i32_12 : i32 to vector<16x128xi32>
    %46 = arith.muli %44, %45 : vector<16x128xi32>
    %c16_i32_13 = arith.constant 16 : i32
    %47 = vector.broadcast %c16_i32_13 : i32 to vector<16x128xi32>
    %48 = arith.shrui %46, %47 : vector<16x128xi32>
    %49 = arith.xori %46, %48 : vector<16x128xi32>
    %c8_i32 = arith.constant 8 : i32
    %50 = vector.broadcast %c8_i32 : i32 to vector<16x128xi32>
    %51 = arith.shrui %49, %50 : vector<16x128xi32>
    %c8388608_i32 = arith.constant 8388608 : i32
    %52 = vector.broadcast %c8388608_i32 : i32 to vector<16x128xi32>
    %53 = arith.cmpi uge, %51, %52 : vector<16x128xi32>
    %cst_14 = arith.constant 0.000000e+00 : f32
    %54 = vector.broadcast %cst_14 : f32 to vector<16x128xf32>
    %55 = arith.select %53, %10, %54 : vector<16x128xi1>, vector<16x128xf32>
    %56 = arith.truncf %55 : vector<16x128xf32> to vector<16x128xbf16>
    %c0_15 = arith.constant 0 : index
    %c0_16 = arith.constant 0 : index
    %57 = vector.load %arg5[%c0_15, %c0_16] : memref<128x128xbf16, #tpu.memory_space<vmem>>, vector<128x128xbf16>
    %cst_17 = arith.constant dense<0.000000e+00> : vector<16x128xf32>
    %58 = tpu.matmul %56, %57, %cst_17 {dimension_numbers = #tpu.dot_dimension_numbers<[1], [0], [0], [1], [0, 0, 1, 1], [], []>} : vector<16x128xbf16>, vector<128x128xbf16>, vector<16x128xf32> -> vector<16x128xf32>
    %c0_18 = arith.constant 0 : index
    %c0_19 = arith.constant 0 : index
    %59 = vector.load %arg6[%c0_18, %c0_19] : memref<1x128xf32, #tpu.memory_space<vmem>>, vector<1x128xf32>
    %60 = vector.broadcast %59 : vector<1x128xf32> to vector<16x128xf32>
    %61 = arith.addf %58, %60 : vector<16x128xf32>
    %cst_20 = arith.constant 0.000000e+00 : f32
    %62 = vector.broadcast %cst_20 : f32 to vector<16x128xf32>
    %63 = arith.maximumf %61, %62 : vector<16x128xf32>
    %64 = tpu.iota {dimensions = array<i32: 0>} : vector<16x128xi32>
    %65 = vector.broadcast %1 : i32 to vector<16x128xi32>
    %66 = arith.addi %64, %65 : vector<16x128xi32>
    %67 = tpu.iota {dimensions = array<i32: 1>} : vector<16x128xi32>
    %c-1640531535_i32_21 = arith.constant -1640531535 : i32
    %68 = vector.broadcast %c-1640531535_i32_21 : i32 to vector<16x128xi32>
    %69 = arith.muli %66, %68 : vector<16x128xi32>
    %c-2048144777_i32_22 = arith.constant -2048144777 : i32
    %70 = vector.broadcast %c-2048144777_i32_22 : i32 to vector<16x128xi32>
    %71 = arith.muli %67, %70 : vector<16x128xi32>
    %72 = arith.xori %69, %71 : vector<16x128xi32>
    %73 = vector.broadcast %0 : i32 to vector<16x128xi32>
    %74 = arith.xori %72, %73 : vector<16x128xi32>
    %c-775537848_i32 = arith.constant -775537848 : i32
    %75 = vector.broadcast %c-775537848_i32 : i32 to vector<16x128xi32>
    %76 = arith.addi %74, %75 : vector<16x128xi32>
    %c16_i32_23 = arith.constant 16 : i32
    %77 = vector.broadcast %c16_i32_23 : i32 to vector<16x128xi32>
    %78 = arith.shrui %76, %77 : vector<16x128xi32>
    %79 = arith.xori %76, %78 : vector<16x128xi32>
    %c2146121005_i32_24 = arith.constant 2146121005 : i32
    %80 = vector.broadcast %c2146121005_i32_24 : i32 to vector<16x128xi32>
    %81 = arith.muli %79, %80 : vector<16x128xi32>
    %c15_i32_25 = arith.constant 15 : i32
    %82 = vector.broadcast %c15_i32_25 : i32 to vector<16x128xi32>
    %83 = arith.shrui %81, %82 : vector<16x128xi32>
    %84 = arith.xori %81, %83 : vector<16x128xi32>
    %c-2073254261_i32_26 = arith.constant -2073254261 : i32
    %85 = vector.broadcast %c-2073254261_i32_26 : i32 to vector<16x128xi32>
    %86 = arith.muli %84, %85 : vector<16x128xi32>
    %c16_i32_27 = arith.constant 16 : i32
    %87 = vector.broadcast %c16_i32_27 : i32 to vector<16x128xi32>
    %88 = arith.shrui %86, %87 : vector<16x128xi32>
    %89 = arith.xori %86, %88 : vector<16x128xi32>
    %c16_i32_28 = arith.constant 16 : i32
    %90 = vector.broadcast %c16_i32_28 : i32 to vector<16x128xi32>
    %91 = arith.shrui %89, %90 : vector<16x128xi32>
    %92 = arith.xori %89, %91 : vector<16x128xi32>
    %c2146121005_i32_29 = arith.constant 2146121005 : i32
    %93 = vector.broadcast %c2146121005_i32_29 : i32 to vector<16x128xi32>
    %94 = arith.muli %92, %93 : vector<16x128xi32>
    %c15_i32_30 = arith.constant 15 : i32
    %95 = vector.broadcast %c15_i32_30 : i32 to vector<16x128xi32>
    %96 = arith.shrui %94, %95 : vector<16x128xi32>
    %97 = arith.xori %94, %96 : vector<16x128xi32>
    %c-2073254261_i32_31 = arith.constant -2073254261 : i32
    %98 = vector.broadcast %c-2073254261_i32_31 : i32 to vector<16x128xi32>
    %99 = arith.muli %97, %98 : vector<16x128xi32>
    %c16_i32_32 = arith.constant 16 : i32
    %100 = vector.broadcast %c16_i32_32 : i32 to vector<16x128xi32>
    %101 = arith.shrui %99, %100 : vector<16x128xi32>
    %102 = arith.xori %99, %101 : vector<16x128xi32>
    %c8_i32_33 = arith.constant 8 : i32
    %103 = vector.broadcast %c8_i32_33 : i32 to vector<16x128xi32>
    %104 = arith.shrui %102, %103 : vector<16x128xi32>
    %c8388608_i32_34 = arith.constant 8388608 : i32
    %105 = vector.broadcast %c8388608_i32_34 : i32 to vector<16x128xi32>
    %106 = arith.cmpi uge, %104, %105 : vector<16x128xi32>
    %cst_35 = arith.constant 2.000000e+00 : f32
    %107 = vector.broadcast %cst_35 : f32 to vector<16x128xf32>
    %108 = arith.mulf %63, %107 : vector<16x128xf32>
    %cst_36 = arith.constant 0.000000e+00 : f32
    %109 = vector.broadcast %cst_36 : f32 to vector<16x128xf32>
    %110 = arith.select %106, %108, %109 : vector<16x128xi1>, vector<16x128xf32>
    %c0_37 = arith.constant 0 : index
    %c0_38 = arith.constant 0 : index
    %111 = vector.load %arg7[%c0_37, %c0_38] : memref<16x128xf32, #tpu.memory_space<vmem>>, vector<16x128xf32>
    tpu.vector_store %arg7[%c0_37, %c0_38], %110 {strides = array<i32>} : memref<16x128xf32, #tpu.memory_space<vmem>>, vector<16x128xf32>,
    return
  }
  func.func @transform_0(%arg0: i32, %arg1: memref<1xi32, #tpu.memory_space<smem>>) -> (i32, i32) {
    %c0_i32 = arith.constant 0 : i32
    %c0_i32_0 = arith.constant 0 : i32
    return %arg0, %c0_i32 : i32, i32
  }
  func.func @transform_1(%arg0: i32, %arg1: memref<1xi32, #tpu.memory_space<smem>>) -> (i32, i32) {
    %c0_i32 = arith.constant 0 : i32
    %c0_i32_0 = arith.constant 0 : i32
    %c0_i32_1 = arith.constant 0 : i32
    return %c0_i32, %c0_i32_0 : i32, i32
  }
  func.func @transform_2(%arg0: i32, %arg1: memref<1xi32, #tpu.memory_space<smem>>) -> (i32, i32) {
    %c0_i32 = arith.constant 0 : i32
    %c0_i32_0 = arith.constant 0 : i32
    %c0_i32_1 = arith.constant 0 : i32
    return %c0_i32, %c0_i32_0 : i32, i32
  }
  func.func @transform_3(%arg0: i32, %arg1: memref<1xi32, #tpu.memory_space<smem>>) -> (i32, i32) {
    %c0_i32 = arith.constant 0 : i32
    %c0_i32_0 = arith.constant 0 : i32
    %c0_i32_1 = arith.constant 0 : i32
    return %c0_i32, %c0_i32_0 : i32, i32
  }
  func.func @transform_4(%arg0: i32, %arg1: memref<1xi32, #tpu.memory_space<smem>>) -> (i32, i32) {
    %c0_i32 = arith.constant 0 : i32
    %c0_i32_0 = arith.constant 0 : i32
    %c0_i32_1 = arith.constant 0 : i32
    return %c0_i32, %c0_i32_0 : i32, i32
  }
  func.func @transform_5(%arg0: i32, %arg1: memref<1xi32, #tpu.memory_space<smem>>) -> (i32, i32) {
    %c0_i32 = arith.constant 0 : i32
    %c0_i32_0 = arith.constant 0 : i32
    return %arg0, %c0_i32 : i32, i32
  }
}

</mosaic_0001>

<bundles_post_ra>
// kernel: tpu_custom_call.1
= control target key start
LH: loop header
LB: loop body
LE: loop exit
PB: predicated region body
PF: predicated region fallthrough
CT: control target
= control target key end

     0   :  { %12 = vsyncpa [#allocation5], 0  ;;  %s680_s0 = inlined_call_operand.<no memory space> [shape: s32[1], index: 0, kind: input, shape index: {}]   ;;  %s681_s1 = inlined_call_operand.hbm [shape: f32[16,128], index: 1, kind: input, shape index: {}]   ;;  %s682_s2 = inlined_call_operand.hbm [shape: bf16[128,128], index: 2, kind: input, shape index: {}]   ;;  %s683_s3 = inlined_call_operand.vmem [shape: f32[1,128], index: 3, kind: input, shape index: {}]   ;;  %s684_s4 = inlined_call_operand.hbm [shape: bf16[128,128], index: 4, kind: input, shape index: {}]   ;;  %s685_s5 = inlined_call_operand.vmem [shape: f32[1,128], index: 5, kind: input, shape index: {}]   ;;  %s686_s6 = inlined_call_operand.hbm [shape: f32[16,128], index: 6, kind: output, shape index: {}]  }
   0x1   :  { %13 = vsyncpa [#allocation8], 0 }
   0x2   :  { %14 = vsyncpa [#allocation6], 0  ;;  %s608_s21 = smov [#allocation7]  }
   0x3   :  { %s32_s22 = sshll.u32 %s608_s21, 4  ;;  %s33_s22 = int_to_ptr.vmem [resolvable:$true] %s32_s22 }
   0x4   :  { %s530_s23 = scalar_lea.vmem %s33_s22, 1024  ;;  %p535_p1 = scmp.lt.s32.totalorder %s33_s22, %s33_s22 }
   0x5   :  { %p531_p0 = scmp.ne.s32.totalorder %s33_s22, %s530_s23  ;;  %p536_p2 = scmp.lt.s32.totalorder %s530_s23, %s530_s23 }
   0x7   :  { %p537_p3 = por %p536_p2, %p535_p1 }
   0x9   :  { %p538_p4 = pnand %p537_p3, %p531_p0 }
   0xb   :  { %541 = shalt.err (!%p538_p4)
}
   0xc   :  { %s609_s24 = smov 64   ;;  %s610_s25 = smov 4  }
   0xd   :  { %38 = dma.hbm_to_vmem [thread:$0]  %s682_s2, 1024, %s33_s22, [#allocation8], %s609_s24, %s609_s24, %s610_s25  }
   0xe   :  { %s611_s28 = smov [#allocation4]  }
   0xf   :  { %s20_s29 = sshll.u32 %s611_s28, 4  ;;  %s21_s29 = int_to_ptr.vmem [resolvable:$true] %s20_s29 }
  0x10   :  { %s550_s30 = scalar_lea.vmem %s21_s29, 256  ;;  %p555_p6 = scmp.lt.s32.totalorder %s21_s29, %s21_s29 }
  0x11   :  { %p551_p5 = scmp.ne.s32.totalorder %s21_s29, %s550_s30  ;;  %p556_p7 = scmp.lt.s32.totalorder %s550_s30, %s550_s30 }
  0x13   :  { %p557_p8 = por %p556_p7, %p555_p6 }
  0x15   :  { %p558_p9 = pnand %p557_p8, %p551_p5 }
  0x17   :  { %561 = shalt.err (!%p558_p9)
}
  0x18   :  { %s612_s7 = smov 128   ;;  %s613_s8 = smov 8  }
  0x19   :  { %26 = dma.hbm_to_vmem [thread:$0]  %s681_s1, 256, %s21_s29, [#allocation5], %s612_s7, %s612_s7, %s613_s8  }
  0x1a   :  { %s614_s2 = smov [#allocation9]  }
  0x1b   :  { %s46_s11 = sshll.u32 %s614_s2, 4  ;;  %s47_s11 = int_to_ptr.vmem [resolvable:$true] %s46_s11 }
  0x1c   :  { %s570_s12 = scalar_lea.vmem %s47_s11, 1024  ;;  %p575_p11 = scmp.lt.s32.totalorder %s47_s11, %s47_s11 }
  0x1d   :  { %p571_p10 = scmp.ne.s32.totalorder %s47_s11, %s570_s12  ;;  %p576_p12 = scmp.lt.s32.totalorder %s570_s12, %s570_s12 }
  0x1f   :  { %p577_p13 = por %p576_p12, %p575_p11 }
  0x21   :  { %p578_p0 = pnand %p577_p13, %p571_p10 }
  0x23   :  { %581 = shalt.err (!%p578_p0)
}
  0x24   :  { %52 = dma.hbm_to_vmem [thread:$0]  %s684_s4, 1024, %s47_s11, [#allocation8], %s609_s24, %s609_s24, %s610_s25  }
  0x25   :  { %602 = dma.done.wait [#allocation5], 256  }
  0x26   :  { %603 = vsyncadd [#allocation5], 4294967040 }
  0x27   :  { %604 = dma.done.wait [#allocation8], 2048  }
  0x28   :  { %605 = vsyncadd [#allocation8], 4294965248  ;;  %v615_v0 = vmov 0.0   ;;  %vm616_vm0 = vmmov 0   ;;  %v506_v1 = vld [vmem:[#allocation7 + $0x38] sm:$0xff]   ;;  %v507_v2 = vld [vmem:[#allocation7 + $0x30] sm:$0xff]   ;;  %v184_v20 = vlaneseq  ;;  %v197_v29 = vstv %s680_s0 }
  0x29   :  { %456 = vmatprep.subr.bf16.mxu0 %v615_v0  ;;  %472 = vmatprep.mubr.msk.bf16.mxu0 %vm616_vm0, %v615_v0  ;;  %v508_v3 = vld [vmem:[#allocation7 + $0x28] sm:$0xff]   ;;  %v514_v4 = vld [vmem:[#allocation9 + $0x38] sm:$0xff]   ;;  %v509_v5 = vld [vmem:[#allocation7 + $0x20] sm:$0xff]   ;;  %s617_s17 = smov [#allocation10]  }
  0x2a   :  { %476 = vmatprep.subr.bf16.mxu1 %v615_v0  ;;  %492 = vmatprep.mubr.msk.bf16.mxu1 %vm616_vm0, %v615_v0  ;;  %v515_v6 = vld [vmem:[#allocation9 + $0x30] sm:$0xff]   ;;  %v510_v7 = vld [vmem:[#allocation7 + $0x18] sm:$0xff]   ;;  %v516_v8 = vld [vmem:[#allocation9 + $0x28] sm:$0xff]   ;;  %v185_v21 = vshrl.u32 %v184_v20, 7  ;;  %v191_v23 = vand.u32 127, %v184_v20  ;;  %s404_s18 = sshll.u32 %s617_s17, 4  ;;  %s405_s18 = int_to_ptr.vmem [resolvable:$true] %s404_s18 }
  0x2b   :  { %457 = vmatpush3.bf16.msra.mxu0 %v506_v1  ;;  %477 = vmatpush3.bf16.msra.mxu1 %v514_v4  ;;  %v511_v9 = vld [vmem:[#allocation7 + $0x10] sm:$0xff]   ;;  %v517_v10 = vld [vmem:[#allocation9 + $0x20] sm:$0xff]   ;;  %v512_v11 = vld [vmem:[#allocation7 + $0x8] sm:$0xff]   ;;  %p587_p2 = scmp.lt.s32.totalorder %s405_s18, %s405_s18 }
  0x2c   :  { %458 = vmatprep.subr.bf16.mxu0 %v615_v0  ;;  %478 = vmatprep.subr.bf16.mxu1 %v615_v0  ;;  %v518_v12 = vld [vmem:[#allocation9 + $0x18] sm:$0xff]   ;;  %v513_v13 = vld [vmem:[#allocation7] sm:$0xff]   ;;  %v67_v14 = vld [vmem:[#allocation4] sm:$0xff]  ;;  %v186_v22 = vadd.s32 8, %v185_v21  ;;  %v192_v24 = vmul.u32 2654435761, %v185_v21 }
  0x2d   :  { %v68_v15 = vld [vmem:[#allocation4 + $0x8] sm:$0xff]  ;;  %v519_v17 = vld [vmem:[#allocation9 + $0x10] sm:$0xff]   ;;  %v520_v18 = vld [vmem:[#allocation9 + $0x8] sm:$0xff]   ;;  %v194_v26 = vmul.u32 2246822519, %v191_v23 }
  0x2e   :  { %v69_v16 = vpack.c.bf16 %v68_v15, %v67_v14  ;;  %v521_v19 = vld [vmem:[#allocation9] sm:$0xff]   ;;  %v193_v25 = vmul.u32 2654435761, %v186_v22 }
  0x2f   :  { %459 = vmatpush3.bf16.msra.mxu0 %v507_v2  ;;  %479 = vmatpush3.bf16.msra.mxu1 %v515_v6  ;;  %v195_v27 = vxor.u32 %v194_v26, %v192_v24  ;;  %v417_v2 = vld [vmem:[%s683_s3] ss:$0 sm:$0xff] }
  0x30   :  { %460 = vmatprep.subr.bf16.mxu0 %v615_v0  ;;  %480 = vmatprep.subr.bf16.mxu1 %v615_v0  ;;  %v196_v28 = vxor.u32 %v194_v26, %v193_v25 }
  0x31   :  { %v198_v30 = vxor.u32 %v197_v29, %v195_v27 }
  0x32   :  { %v199_v31 = vxor.u32 %v197_v29, %v196_v28 }
  0x33   :  { %461 = vmatpush3.bf16.msra.mxu0 %v508_v3  ;;  %481 = vmatpush3.bf16.msra.mxu1 %v516_v8  ;;  %v200_v32 = vadd.s32 1759714724, %v198_v30  ;;  %v355_v14 = vadd.s32 3519429448, %v198_v30 }
  0x34   :  { %462 = vmatprep.subr.bf16.mxu0 %v615_v0  ;;  %482 = vmatprep.subr.bf16.mxu1 %v615_v0  ;;  %v201_v33 = vadd.s32 1759714724, %v199_v31 }
  0x35   :  { %v202_v34 = vshrl.u32 %v200_v32, 16  ;;  %v357_v15 = vshrl.u32 %v355_v14, 16 }
  0x36   :  { %v203_v35 = vshrl.u32 %v201_v33, 16 }
  0x37   :  { %463 = vmatpush3.bf16.msra.mxu0 %v509_v5  ;;  %483 = vmatpush3.bf16.msra.mxu1 %v517_v10  ;;  %v204_v36 = vxor.u32 %v202_v34, %v200_v32 }
  0x38   :  { %464 = vmatprep.subr.bf16.mxu0 %v615_v0  ;;  %484 = vmatprep.subr.bf16.mxu1 %v615_v0  ;;  %v205_v37 = vxor.u32 %v203_v35, %v201_v33 }
  0x39   :  { %v206_v38 = vmul.u32 2146121005, %v204_v36 }
  0x3a   :  { %v207_v39 = vmul.u32 2146121005, %v205_v37 }
  0x3b   :  { %465 = vmatpush3.bf16.msra.mxu0 %v510_v7  ;;  %485 = vmatpush3.bf16.msra.mxu1 %v518_v12  ;;  %v208_v40 = vshrl.u32 %v206_v38, 15 }
  0x3c   :  { %466 = vmatprep.subr.bf16.mxu0 %v615_v0  ;;  %486 = vmatprep.subr.bf16.mxu1 %v615_v0  ;;  %v209_v41 = vshrl.u32 %v207_v39, 15 }
  0x3d   :  { %v210_v42 = vxor.u32 %v208_v40, %v206_v38 }
  0x3e   :  { %v211_v43 = vxor.u32 %v209_v41, %v207_v39 }
  0x3f   :  { %467 = vmatpush3.bf16.msra.mxu0 %v511_v9  ;;  %487 = vmatpush3.bf16.msra.mxu1 %v519_v17  ;;  %v212_v44 = vmul.u32 2221713035, %v210_v42  ;;  %v359_v17 = vxor.u32 %v357_v15, %v355_v14 }
  0x40   :  { %468 = vmatprep.subr.bf16.mxu0 %v615_v0  ;;  %488 = vmatprep.subr.bf16.mxu1 %v615_v0  ;;  %v213_v45 = vmul.u32 2221713035, %v211_v43 }
  0x41   :  { %v214_v46 = vshrl.u32 %v212_v44, 16 }
  0x42   :  { %v215_v47 = vshrl.u32 %v213_v45, 16 }
  0x43   :  { %469 = vmatpush3.bf16.msra.mxu0 %v512_v11  ;;  %489 = vmatpush3.bf16.msra.mxu1 %v520_v18  ;;  %v216_v48 = vxor.u32 %v214_v46, %v212_v44 }
  0x44   :  { %470 = vmatprep.subr.bf16.mxu0 %v615_v0  ;;  %490 = vmatprep.subr.bf16.mxu1 %v615_v0  ;;  %v217_v49 = vxor.u32 %v215_v47, %v213_v45  ;;  %v426_v47 = vld [vmem:[%s685_s5] ss:$0 sm:$0xff]  ;;  %s582_s5 = scalar_lea.vmem %s405_s18, 256 }
  0x45   :  { %v218_v50 = vshrl.u32 %v216_v48, 16  ;;  %p583_p1 = scmp.ne.s32.totalorder %s405_s18, %s582_s5  ;;  %p588_p3 = scmp.lt.s32.totalorder %s582_s5, %s582_s5 }
  0x46   :  { %v219_v51 = vshrl.u32 %v217_v49, 16 }
  0x47   :  { %471 = vmatpush3.bf16.msra.mxu0 %v513_v13  ;;  %491 = vmatpush3.bf16.msra.mxu1 %v521_v19  ;;  %v220_v52 = vxor.u32 %v218_v50, %v216_v48  ;;  %v361_v19 = vmul.u32 2146121005, %v359_v17  ;;  %p589_p4 = por %p588_p3, %p587_p2 }
  0x48   :  { %v221_v53 = vxor.u32 %v219_v51, %v217_v49 }
  0x49   :  { %v222_v54 = vmul.u32 2146121005, %v220_v52  ;;  %v363_v21 = vshrl.u32 %v361_v19, 15  ;;  %p590_p5 = pnand %p589_p4, %p583_p1 }
  0x4a   :  { %473 = vmatmul.mubr.bf16.vlgmr.msra.gmra.mxu0 %v69_v16  ;;  %v223_v55 = vmul.u32 2146121005, %v221_v53  ;;  %v356_v16 = vadd.s32 3519429448, %v199_v31 }
  0x4b   :  { %v224_v56 = vshrl.u32 %v222_v54, 15  ;;  %v365_v23 = vxor.u32 %v363_v21, %v361_v19 }
  0x4c   :  { %v225_v57 = vshrl.u32 %v223_v55, 15  ;;  %v358_v18 = vshrl.u32 %v356_v16, 16 }
  0x4d   :  { %v226_v58 = vxor.u32 %v224_v56, %v222_v54  ;;  %v367_v25 = vmul.u32 2221713035, %v365_v23 }
  0x4e   :  { %v227_v59 = vxor.u32 %v225_v57, %v223_v55  ;;  %v360_v20 = vxor.u32 %v358_v18, %v356_v16 }
  0x4f   :  { %v228_v60 = vmul.u32 2221713035, %v226_v58  ;;  %v369_v27 = vshrl.u32 %v367_v25, 16 }
  0x50   :  { %v229_v61 = vmul.u32 2221713035, %v227_v59  ;;  %v362_v22 = vmul.u32 2146121005, %v360_v20 }
  0x51   :  { %v230_v62 = vshrl.u32 %v228_v60, 16  ;;  %v371_v29 = vxor.u32 %v369_v27, %v367_v25 }
  0x52   :  { %v231_v63 = vshrl.u32 %v229_v61, 16  ;;  %v364_v24 = vshrl.u32 %v362_v22, 15 }
  0x53   :  { %v232_v0 = vxor.u32 %v230_v62, %v228_v60  ;;  %v373_v33 = vshrl.u32 %v371_v29, 16 }
  0x54   :  { %v233_v1 = vxor.u32 %v231_v63, %v229_v61  ;;  %v366_v26 = vxor.u32 %v364_v24, %v362_v22 }
  0x55   :  { %v234_v4 = vshrl.u32 %v232_v0, 8  ;;  %v375_v35 = vxor.u32 %v373_v33, %v371_v29 }
  0x56   :  { %v235_v5 = vshrl.u32 %v233_v1, 8  ;;  %v368_v28 = vmul.u32 2221713035, %v366_v26 }
  0x57   :  { %vm236_vm1 = vcmp.ge.u32.totalorder %v234_v4, 8388608  ;;  %v377_v36 = vmul.u32 2146121005, %v375_v35 }
  0x58   :  { %vm237_vm2 = vcmp.ge.u32.totalorder %v235_v5, 8388608  ;;  %v370_v32 = vshrl.u32 %v368_v28, 16 }
  0x59   :  { %vm435_vm3 = vmpackc.low %vm237_vm2, %vm236_vm1  ;;  %v379_v37 = vshrl.u32 %v377_v36, 15 }
  0x5a   :  { %v372_v34 = vxor.u32 %v370_v32, %v368_v28 }
  0x5b   :  { %v381_v39 = vxor.u32 %v379_v37, %v377_v36 }
  0x5c   :  { %v374_v30 = vshrl.u32 %v372_v34, 16 }
  0x5d   :  { %v383_v41 = vmul.u32 2221713035, %v381_v39 }
  0x5e   :  { %v376_v31 = vxor.u32 %v374_v30, %v372_v34 }
  0x5f   :  { %v385_v43 = vshrl.u32 %v383_v41, 16 }
  0x60   :  { %v378_v38 = vmul.u32 2146121005, %v376_v31 }
  0x61   :  { %v387_v45 = vxor.u32 %v385_v43, %v383_v41 }
  0x62   :  { %v380_v40 = vshrl.u32 %v378_v38, 15 }
  0x63   :  { %v389_v49 = vshrl.u32 %v387_v45, 8 }
  0x64   :  { %v382_v42 = vxor.u32 %v380_v40, %v378_v38 }
  0x65   :  { %vm391_vm4 = vcmp.ge.u32.totalorder %v389_v49, 8388608 }
  0x66   :  { %v384_v44 = vmul.u32 2221713035, %v382_v42 }
  0x68   :  { %v386_v46 = vshrl.u32 %v384_v44, 16 }
  0x6a   :  { %v388_v50 = vxor.u32 %v386_v46, %v384_v44 }
  0x6c   :  { %v390_v55 = vshrl.u32 %v388_v50, 8 }
  0x6e   :  { %vm392_vm5 = vcmp.ge.u32.totalorder %v390_v55, 8388608 }
 0x10a   :  { %v175_v3 = vpop.f32.mrf.mxu0 }
 0x10b   :  { %v176_v7 = vadd.f32 %v417_v2, %v175_v3 }
 0x10c   :  { %v474_v6 = vpop.f32.mrf.mxu0 }
 0x10d   :  { %v182_v11 = vmax.f32 %v176_v7, 0.0 }
 0x10e   :  { %v178_v8 = vpop.f32.mrf.mxu0 }
 0x10f   :  { %v179_v9 = vadd.f32 %v417_v2, %v178_v8 }
 0x110   :  { %v475_v10 = vpop.f32.mrf.mxu0 }
 0x111   :  { %v183_v12 = vmax.f32 %v179_v9, 0.0 }
 0x113   :  { %v436_v13 = vpack.c.bf16 %v183_v12, %v182_v11 }
 0x115   :  { %493 = vmatmul.mubr.msk.bf16.vlgmr.msra.gmra.mxu1 %vm435_vm3, %v436_v13 }
 0x1d5   :  { %v346_v48 = vpop.f32.mrf.mxu1 }
 0x1d6   :  { %v347_v51 = vadd.f32 %v426_v47, %v346_v48 }
 0x1d7   :  { %v494_v52 = vpop.f32.mrf.mxu1 }
 0x1d8   :  { %v353_v53 = vmax.f32 %v347_v51, 0.0 }
 0x1d9   :  { %v349_v54 = vpop.f32.mrf.mxu1 }
 0x1da   :  { %v393_v56 = vmul.f32 2.0, %v353_v53  ;;  %v350_v57 = vadd.f32 %v426_v47, %v349_v54 }
 0x1db   :  { %v495_v58 = vpop.f32.mrf.mxu1 }
 0x1dc   :  { %v395_v59 = vsel %vm391_vm4, %v393_v56, 0.0  ;;  %v354_v60 = vmax.f32 %v350_v57, 0.0 }
 0x1dd   :  { %397 = vst [vmem:[#allocation10] sm:$0xff] %v395_v59 }
 0x1de   :  { %v394_v61 = vmul.f32 2.0, %v354_v60 }
 0x1e0   :  { %v396_v62 = vsel %vm392_vm5, %v394_v61, 0.0 }
 0x1e1   :  { %398 = vst [vmem:[#allocation10 + $0x8] sm:$0xff] %v396_v62 }
 0x1e2   :  { %593 = shalt.err (!%p590_p5)
}
 0x1e3   :  { %410 = dma.vmem_to_hbm [thread:$0]  %s405_s18, 256, %s686_s6, [#allocation6], %s612_s7, %s612_s7, %s613_s8  }
 0x1e4   :  { %606 = dma.done.wait [#allocation6], 256  }
 0x1e5   :  { %607 = vsyncadd [#allocation6], 4294967040 }
 0x1e6   :  { %414 = vsyncpa [#allocation5], 1 }
 0x1e7   :  { %415 = vsyncpa [#allocation8], 1 }
 0x1e8   :  { %416 = vsyncpa [#allocation6], 1 }

</bundles_post_ra>
